<compile_context>
chip_gen: v7x
topology: tpu7x:2x2x1
jax: 0.10.0
libtpu: 0.0.40
codegen_flags: <defaults>
</compile_context>

<pallas_src>
import jax
import jax.numpy as jnp
from jax.experimental import pallas as pl
from jax.experimental.pallas import tpu as pltpu

LANE = 128
SUB = 8

# Rows per grid step on the tiled (large-input) path. (1024,128) f32 x 3 inputs
# x 2 pipeline buffers = 3 MiB of VMEM -- fits v5e/v6e (128 MiB) and v7x
# (64 MiB) with large headroom.
BLOCK_ROWS = 1024

# At or below this many rows the whole slab fits trivially in VMEM and a single
# block (no grid, no accumulators) is fastest.
SINGLE_BLOCK_MAX_ROWS = 2048


def _distill_single_block_kernel(s_ref, t_ref, y_ref, out_ref):
    """Whole-array block: compute both sums once, one packed SMEM store."""
    s = s_ref[...].astype(jnp.float32)
    t = t_ref[...].astype(jnp.float32)
    y = y_ref[...].astype(jnp.float32)
    d_pix = s - y
    d_soft = s - t
    out_ref[0, 0] = jnp.sum(jnp.abs(d_pix))      # sum |s - y|
    out_ref[0, 1] = jnp.sum(d_soft * d_soft)     # sum (s - t)^2


def _distill_tiled_kernel(s_ref, t_ref, y_ref, out_ref, abs_acc, sq_acc):
    """Tiled path: per-step VPU-only vector accumulation, one XLU reduce at end."""
    i = pl.program_id(0)

    @pl.when(i == 0)
    def _():
        abs_acc[...] = jnp.zeros_like(abs_acc)
        sq_acc[...] = jnp.zeros_like(sq_acc)

    s = s_ref[...].astype(jnp.float32)
    t = t_ref[...].astype(jnp.float32)
    y = y_ref[...].astype(jnp.float32)
    d_pix = jnp.abs(s - y)
    d_soft = s - t
    d_soft = d_soft * d_soft
    # Fold the (BLOCK_ROWS, 128) tile into the (8, 128) accumulators with pure
    # vreg-wise adds: the reshape keeps the (8,128) minor tile intact, so the
    # axis-0 sum is plain VPU work (no lane/sublane crossing per step).
    abs_acc[...] += jnp.sum(d_pix.reshape(-1, SUB, LANE), axis=0)
    sq_acc[...] += jnp.sum(d_soft.reshape(-1, SUB, LANE), axis=0)

    @pl.when(i == pl.num_programs(0) - 1)
    def _():
        out_ref[0, 0] = jnp.sum(abs_acc[...])
        out_ref[0, 1] = jnp.sum(sq_acc[...])


def distillation_loss(student_out, teacher_out, target, alpha=0.5):
    """Pallas equivalent of DistillationLoss.forward.

    Returns (total_loss, pixel_loss, soft_loss) as float32 scalars.
    """
    # TODO(synk): forward-only; training would need a custom_vjp with an
    # elementwise backward kernel (d_pixel = sign(s-y)/n, d_soft = 2(s-t)/n).
    assert student_out.shape == teacher_out.shape == target.shape
    n = student_out.size  # mean denominator

    def prep(x, rows):
        # Lane-dense 2D slab in the *native* dtype (cast happens in-kernel).
        # Zero-padding contributes 0 to both |s-y| and (s-t)^2 since all three
        # tensors are padded with the same constant.
        flat = x.reshape(-1)
        pad = rows * LANE - n
        if pad:
            flat = jnp.pad(flat, (0, pad))
        return flat.reshape(rows, LANE)

    rows = pl.cdiv(n, LANE)
    out_shape = jax.ShapeDtypeStruct((1, 2), jnp.float32)
    smem_out_spec = pl.BlockSpec(memory_space=pltpu.MemorySpace.SMEM)

    if rows <= SINGLE_BLOCK_MAX_ROWS:
        # Single full-array block: no grid, no accumulator machinery.
        s2d, t2d, y2d = (prep(x, rows) for x in (student_out, teacher_out, target))
        sums = pl.pallas_call(
            _distill_single_block_kernel,
            out_shape=out_shape,
            in_specs=[pl.BlockSpec(memory_space=pltpu.MemorySpace.VMEM)] * 3,
            out_specs=smem_out_spec,
        )(s2d, t2d, y2d)
    else:
        # Streaming mem-bound reduction over large activation maps.
        # TODO(synk): on v7x, split the row range across the 2 TensorCores
        # (per-core partials summed in the wrapper) for ~2x HBM bandwidth.
        rows = ((rows + BLOCK_ROWS - 1) // BLOCK_ROWS) * BLOCK_ROWS
        s2d, t2d, y2d = (prep(x, rows) for x in (student_out, teacher_out, target))
        sums = pl.pallas_call(
            _distill_tiled_kernel,
            out_shape=out_shape,
            grid=(rows // BLOCK_ROWS,),
            in_specs=[pl.BlockSpec((BLOCK_ROWS, LANE), lambda i: (i, 0))] * 3,
            out_specs=smem_out_spec,
            scratch_shapes=[
                pltpu.VMEM((SUB, LANE), jnp.float32),
                pltpu.VMEM((SUB, LANE), jnp.float32),
            ],
            compiler_params=pltpu.CompilerParams(
                dimension_semantics=("arbitrary",)
            ),
        )(s2d, t2d, y2d)

    inv_n = jnp.float32(1.0 / n)
    pixel_loss = sums[0, 0] * inv_n        # nn.L1Loss (mean reduction)
    soft_loss = sums[0, 1] * inv_n         # nn.MSELoss (mean reduction)
    total_loss = alpha * pixel_loss + (1.0 - alpha) * soft_loss
    return total_loss, pixel_loss, soft_loss


if __name__ == "__main__":
    key = jax.random.PRNGKey(0)
    k1, k2, k3 = jax.random.split(key, 3)

    B, C, H, W = 2, 4, 16, 16  # NCHW, matching the PyTorch convention
    student = jax.random.normal(k1, (B, C, H, W), dtype=jnp.float32)
    teacher = jax.random.normal(k2, (B, C, H, W), dtype=jnp.float32)
    target = jax.random.normal(k3, (B, C, H, W), dtype=jnp.float32)

    alpha = 0.5
    total, pixel, soft = distillation_loss(student, teacher, target, alpha=alpha)
    jax.block_until_ready((total, pixel, soft))

    # sanity check against a pure-JAX reference
    ref_pixel = jnp.mean(jnp.abs(student - target))
    ref_soft = jnp.mean((student - teacher) ** 2)
    ref_total = alpha * ref_pixel + (1.0 - alpha) * ref_soft
    assert jnp.allclose(pixel, ref_pixel, rtol=1e-5, atol=1e-6)
    assert jnp.allclose(soft, ref_soft, rtol=1e-5, atol=1e-6)
    assert jnp.allclose(total, ref_total, rtol=1e-5, atol=1e-6)

    print("KERNEL_OK")
</pallas_src>

<mosaic_0001>
module attributes {stable_mosaic.version = 11 : i64} {
  func.func @_distill_single_block_kernel(%arg0: memref<16x128xf32, #tpu.memory_space<vmem>>, %arg1: memref<16x128xf32, #tpu.memory_space<vmem>>, %arg2: memref<16x128xf32, #tpu.memory_space<vmem>>, %arg3: memref<1x2xf32, #tpu.memory_space<smem>>) attributes {dimension_semantics = [], scalar_prefetch = 0 : i64, scratch_operands = 0 : i64, tpu.core_type = #tpu.core_type<tc>} {
    %c0 = arith.constant 0 : index
    %c0_0 = arith.constant 0 : index
    %0 = vector.load %arg0[%c0, %c0_0] : memref<16x128xf32, #tpu.memory_space<vmem>>, vector<16x128xf32>
    %c0_1 = arith.constant 0 : index
    %c0_2 = arith.constant 0 : index
    %1 = vector.load %arg1[%c0_1, %c0_2] : memref<16x128xf32, #tpu.memory_space<vmem>>, vector<16x128xf32>
    %c0_3 = arith.constant 0 : index
    %c0_4 = arith.constant 0 : index
    %2 = vector.load %arg2[%c0_3, %c0_4] : memref<16x128xf32, #tpu.memory_space<vmem>>, vector<16x128xf32>
    %3 = arith.subf %0, %2 : vector<16x128xf32>
    %4 = arith.subf %0, %1 : vector<16x128xf32>
    %5 = math.absf %3 : vector<16x128xf32>
    %6 = vector.shape_cast %5 : vector<16x128xf32> to vector<1x16x128xf32>
    %cst = arith.constant dense<0.000000e+00> : vector<1xf32>
    %7 = vector.multi_reduction <add>, %6, %cst [1, 2] : vector<1x16x128xf32> to vector<1xf32>
    %8 = vector.shape_cast %7 : vector<1xf32> to vector<1x1x1xf32>
    %9 = vector.extract %8[0, 0, 0] : f32 from vector<1x1x1xf32>
    %c0_5 = arith.constant 0 : index
    %c0_6 = arith.constant 0 : index
    %10 = memref.load %arg3[%c0_5, %c0_6] : memref<1x2xf32, #tpu.memory_space<smem>>
    memref.store %9, %arg3[%c0_5, %c0_6] : memref<1x2xf32, #tpu.memory_space<smem>>
    %11 = arith.mulf %4, %4 : vector<16x128xf32>
    %12 = vector.shape_cast %11 : vector<16x128xf32> to vector<1x16x128xf32>
    %cst_7 = arith.constant dense<0.000000e+00> : vector<1xf32>
    %13 = vector.multi_reduction <add>, %12, %cst_7 [1, 2] : vector<1x16x128xf32> to vector<1xf32>
    %14 = vector.shape_cast %13 : vector<1xf32> to vector<1x1x1xf32>
    %15 = vector.extract %14[0, 0, 0] : f32 from vector<1x1x1xf32>
    %c0_8 = arith.constant 0 : index
    %c1 = arith.constant 1 : index
    %16 = memref.load %arg3[%c0_8, %c1] : memref<1x2xf32, #tpu.memory_space<smem>>
    memref.store %15, %arg3[%c0_8, %c1] : memref<1x2xf32, #tpu.memory_space<smem>>
    return
  }
}

</mosaic_0001>

<bundles_post_ra>
// kernel: tpu_custom_call.1
= control target key start
LH: loop header
LB: loop body
LE: loop exit
PB: predicated region body
PF: predicated region fallthrough
CT: control target
= control target key end

     0   :  { %8 = vsyncpa [#allocation3], 0  ;;  %s291_s0 = inlined_call_operand.hbm [shape: f32[16,128], index: 0, kind: input, shape index: {}]   ;;  %s292_s1 = inlined_call_operand.hbm [shape: f32[16,128], index: 1, kind: input, shape index: {}]   ;;  %s293_s2 = inlined_call_operand.hbm [shape: f32[16,128], index: 2, kind: input, shape index: {}]   ;;  %s294_s3 = inlined_call_operand.hbm [shape: f32[1,2], index: 3, kind: output, shape index: {}]  }
   0x1   :  { %9 = vsyncpa [#allocation6], 0 }
   0x2   :  { %10 = vsyncpa [#allocation4], 0  ;;  %s201_s12 = smov [#allocation5]   ;;  %s202_s14 = smov [#allocation2]  }
   0x3   :  { %s28_s13 = sshll.u32 %s201_s12, 4  ;;  %s16_s15 = sshll.u32 %s202_s14, 4  ;;  %s29_s13 = int_to_ptr.vmem [resolvable:$true] %s28_s13  ;;  %s227_s15 = int_to_ptr.vmem [resolvable:$true] %s16_s15 }
   0x4   :  { %s119_s18 = scalar_lea.hbm %s292_s1, 256 }
   0x5   :  { %p120_p0 = scmp.ne.s32.totalorder %s292_s1, %s119_s18  ;;  %p123_p1 = scmp.lt.u32.totalorder %s119_s18, %s292_s1 }
   0x7   :  { %p125_p2 = pnand %p123_p1, %p120_p0 }
   0x9   :  { %128 = shalt.err (!%p125_p2)
}
   0xa   :  { %s129_s23 = scalar_lea.vmem %s29_s13, 256  ;;  %p134_p4 = scmp.lt.s32.totalorder %s29_s13, %s29_s13 }
   0xb   :  { %p130_p3 = scmp.ne.s32.totalorder %s29_s13, %s129_s23  ;;  %p135_p5 = scmp.lt.s32.totalorder %s129_s23, %s129_s23 }
   0xd   :  { %p136_p6 = por %p135_p5, %p134_p4 }
   0xf   :  { %p137_p7 = pnand %p136_p6, %p130_p3 }
  0x11   :  { %140 = shalt.err (!%p137_p7)
}
  0x12   :  { %s203_s24 = smov 128   ;;  %s204_s25 = smov 8  }
  0x13   :  { %34 = dma.hbm_to_vmem [thread:$0]  %s292_s1, 256, %s29_s13, [#allocation6], %s203_s24, %s203_s24, %s204_s25  }
  0x14   :  { %s141_s30 = scalar_lea.hbm %s291_s0, 256 }
  0x15   :  { %p142_p8 = scmp.ne.s32.totalorder %s291_s0, %s141_s30  ;;  %p145_p9 = scmp.lt.u32.totalorder %s141_s30, %s291_s0 }
  0x17   :  { %p147_p10 = pnand %p145_p9, %p142_p8 }
  0x19   :  { %150 = shalt.err (!%p147_p10)
}
  0x1a   :  { %s151_s8 = scalar_lea.vmem %s227_s15, 256  ;;  %p156_p12 = scmp.lt.s32.totalorder %s227_s15, %s227_s15 }
  0x1b   :  { %p152_p11 = scmp.ne.s32.totalorder %s227_s15, %s151_s8  ;;  %p157_p13 = scmp.lt.s32.totalorder %s151_s8, %s151_s8 }
  0x1d   :  { %p158_p0 = por %p157_p13, %p156_p12 }
  0x1f   :  { %p159_p1 = pnand %p158_p0, %p152_p11 }
  0x21   :  { %162 = shalt.err (!%p159_p1)
}
  0x22   :  { %22 = dma.hbm_to_vmem [thread:$0]  %s291_s0, 256, %s227_s15, [#allocation3], %s203_s24, %s203_s24, %s204_s25  }
  0x23   :  { %s205_s10 = smov [#allocation7]   ;;  %s163_s14 = scalar_lea.hbm %s293_s2, 256 }
  0x24   :  { %s40_s11 = sshll.u32 %s205_s10, 4  ;;  %p164_p2 = scmp.ne.s32.totalorder %s293_s2, %s163_s14  ;;  %s41_s11 = int_to_ptr.vmem [resolvable:$true] %s40_s11 }
  0x25   :  { %p167_p3 = scmp.lt.u32.totalorder %s163_s14, %s293_s2 }
  0x27   :  { %p169_p4 = pnand %p167_p3, %p164_p2 }
  0x29   :  { %172 = shalt.err (!%p169_p4)
}
  0x2a   :  { %s173_s20 = scalar_lea.vmem %s41_s11, 256  ;;  %p178_p6 = scmp.lt.s32.totalorder %s41_s11, %s41_s11 }
  0x2b   :  { %p174_p5 = scmp.ne.s32.totalorder %s41_s11, %s173_s20  ;;  %p179_p7 = scmp.lt.s32.totalorder %s173_s20, %s173_s20 }
  0x2d   :  { %p180_p8 = por %p179_p7, %p178_p6 }
  0x2f   :  { %p181_p9 = pnand %p180_p8, %p174_p5 }
  0x31   :  { %184 = shalt.err (!%p181_p9)
}
  0x32   :  { %46 = dma.hbm_to_vmem [thread:$0]  %s293_s2, 256, %s41_s11, [#allocation6], %s203_s24, %s203_s24, %s204_s25  }
  0x33   :  { %195 = dma.done.wait [#allocation3], 256  }
  0x34   :  { %196 = vsyncadd [#allocation3], 4294967040 }
  0x35   :  { %197 = dma.done.wait [#allocation6], 512  }
  0x36   :  { %198 = vsyncadd [#allocation6], 4294966784  ;;  %v56_v0 = vld [vmem:[#allocation2] sm:$0xff]  ;;  %v57_v1 = vld [vmem:[#allocation2 + $0x8] sm:$0xff]  ;;  %s185_s24 = scalar_lea.hbm %s294_s3, 16 }
  0x37   :  { %v60_v2 = vld [vmem:[#allocation7] sm:$0xff]  ;;  %v61_v3 = vld [vmem:[#allocation7 + $0x8] sm:$0xff]  ;;  %v58_v5 = vld [vmem:[#allocation5] sm:$0xff]  ;;  %p186_p10 = scmp.ne.s32.totalorder %s294_s3, %s185_s24  ;;  %p189_p11 = scmp.lt.u32.totalorder %s185_s24, %s294_s3 }
  0x38   :  { %v62_v4 = vsub.f32 %v56_v0, %v60_v2  ;;  %v59_v6 = vld [vmem:[#allocation5 + $0x8] sm:$0xff]  ;;  %v63_v7 = vsub.f32 %v57_v1, %v61_v3  ;;  %v64_v8 = vsub.f32 %v56_v0, %v58_v5 }
  0x39   :  { %v65_v9 = vsub.f32 %v57_v1, %v59_v6  ;;  %p191_p12 = pnand %p189_p11, %p186_p10 }
  0x3a   :  { %v66_v10 = vand.u32 2147483647, %v62_v4  ;;  %v67_v11 = vand.u32 2147483647, %v63_v7  ;;  %v80_v12 = vmul.f32 %v64_v8, %v64_v8 }
  0x3b   :  { %v81_v13 = vmul.f32 %v65_v9, %v65_v9 }
  0x3c   :  { %v68_v14 = vadd.f32 %v67_v11, %v66_v10 }
  0x3d   :  { %v82_v15 = vadd.f32 %v81_v13, %v80_v12 }
  0x3e   :  { %69 = vadd.xlane.f32.xlu0 %v68_v14 }
  0x42   :  { %83 = vadd.xlane.f32.xlu0 %v82_v15 }
  0xcb   :  { %v70_v16 = vpop.xlane.xlu0 %69 }
  0xcc   :  { %v71_v17 = vrot.slane %v70_v16, 4 }
  0xce   :  { %v72_v18 = vadd.f32 %v71_v17, %v70_v16 }
  0xcf   :  { %v84_v19 = vpop.xlane.xlu0 %83 }
  0xd0   :  { %v73_v20 = vrot.slane %v72_v18, 2  ;;  %v85_v21 = vrot.slane %v84_v19, 4 }
  0xd2   :  { %v86_v22 = vadd.f32 %v85_v21, %v84_v19  ;;  %v74_v23 = vadd.f32 %v73_v20, %v72_v18 }
  0xd4   :  { %v87_v24 = vrot.slane %v86_v22, 2  ;;  %v75_v25 = vrot.slane %v74_v23, 1 }
  0xd6   :  { %v88_v26 = vadd.f32 %v87_v24, %v86_v22  ;;  %v76_v27 = vadd.f32 %v75_v25, %v74_v23 }
  0xd8   :  { %109 = vpush %v76_v27  ;;  %v89_v28 = vrot.slane %v88_v26, 1 }
  0xda   :  { %v90_v29 = vadd.f32 %v89_v28, %v88_v26 }
  0xdc   :  { %111 = vpush %v90_v29 }
 0x109   :  { %s110_s2 = spop %109 }
 0x10a   :  { %79 = sst [smem:[#allocation8]] %s110_s2 }
 0x10d   :  { %s112_s21 = spop %111 }
 0x10e   :  { %93 = sst [smem:[#allocation8 + $0x1]] %s112_s21 }
 0x10f   :  { %194 = shalt.err (!%p191_p12)
}
 0x110   :  { %s206_s29 = smov [#allocation8]  }
 0x111   :  { %101 = dma.smem_to_hbm %s206_s29, 16, %s294_s3, [#allocation4]  }
 0x112   :  { %199 = dma.done.wait [#allocation4], 16  }
 0x113   :  { %200 = vsyncadd [#allocation4], 4294967280 }
 0x114   :  { %105 = sfence }
 0x115   :  { %106 = vsyncpa [#allocation3], 1 }
 0x116   :  { %107 = vsyncpa [#allocation6], 1 }
 0x117   :  { %108 = vsyncpa [#allocation4], 1 }

</bundles_post_ra>
